<compile_context>
chip_gen: v5e
topology: v5e:2x2
jax: 0.10.0
libtpu: 0.0.40
codegen_flags: <defaults>
</compile_context>

<pallas_src>
import jax
import jax.numpy as jnp
from jax.experimental import pallas as pl
from jax.experimental.pallas import tpu as pltpu

HIDDEN = 256
BN_EPS = 1e-5
DROP_P = 0.5          # keep prob 0.5 -> sign-bit test, scale 2.0
PAD_OUT = 128         # lane-dense padded width for the fc4/softmax output
NEG_BIG = -1e30       # pad-logit value (exp() underflows to exactly 0)


def _hidden_layer(h, w_ref, b_ref, g_ref, beta_ref, rbits, inv_b):
    # Linear: bf16 operands on the MXU, f32 accumulation, then bias + ReLU.
    h = jnp.dot(h.astype(jnp.bfloat16), w_ref[...],
                preferred_element_type=jnp.float32) + b_ref[...]
    h = jnp.maximum(h, 0.0)

    # BatchNorm1d (train mode, biased batch statistics) fused to scale/shift.
    mean = jnp.sum(h, axis=0, keepdims=True) * inv_b
    mean_sq = jnp.sum(h * h, axis=0, keepdims=True) * inv_b
    var = jnp.maximum(mean_sq - mean * mean, 0.0)
    scale = g_ref[...] * jax.lax.rsqrt(var + BN_EPS)
    shift = beta_ref[...] - mean * scale
    h = h * scale + shift

    # Dropout(p=0.5): keep iff the sign bit of the random word is set; the
    # 1/(1-p) = 2.0 scale is folded into the select.
    keep2 = jnp.where(rbits < 0, jnp.float32(2.0), jnp.float32(0.0))
    return h * keep2


def dnn_kernel(x_ref, rnd_ref,
               w1_ref, b1_ref, g1_ref, be1_ref,
               w2_ref, b2_ref, g2_ref, be2_ref,
               w3_ref, b3_ref, g3_ref, be3_ref,
               w4_ref, b4_ref,
               out_ref):
    inv_b = jnp.float32(1.0 / x_ref.shape[0])

    h = x_ref[...]
    h = _hidden_layer(h, w1_ref, b1_ref, g1_ref, be1_ref, rnd_ref[0], inv_b)
    h = _hidden_layer(h, w2_ref, b2_ref, g2_ref, be2_ref, rnd_ref[1], inv_b)
    h = _hidden_layer(h, w3_ref, b3_ref, g3_ref, be3_ref, rnd_ref[2], inv_b)

    # fc4 (lane-dense: padded to 128 output columns; pad bias = -1e30) + softmax.
    logits = jnp.dot(h.astype(jnp.bfloat16), w4_ref[...],
                     preferred_element_type=jnp.float32) + b4_ref[...]
    m = jnp.max(logits, axis=1, keepdims=True)
    e = jnp.exp(logits - m)
    denom = jnp.sum(e, axis=1, keepdims=True)
    # NOTE: on a TPU-only build, pl.reciprocal(denom, approx=True) moves this to
    # the idle EUP slot; a plain divide is kept here for interpret-mode safety.
    out_ref[...] = e / denom


def dnn_forward(x, params, rng_key):
    """x: (B, input_size) float32 -> (B, output_size) float32, train-mode fwd."""
    B = x.shape[0]
    out_size = params["w4"].shape[1]

    # All dropout bits drawn once: one int32 word per (layer, row, feature).
    rnd = jax.lax.bitcast_convert_type(
        jax.random.bits(rng_key, (3, B, HIDDEN), dtype=jnp.uint32), jnp.int32)

    # MXU operands in bf16 (accumulation stays f32 inside the kernel).
    bf16 = jnp.bfloat16
    w1 = params["w1"].astype(bf16)
    w2 = params["w2"].astype(bf16)
    w3 = params["w3"].astype(bf16)
    # fc4 padded to a lane-dense 128-wide output: zero weights and -1e30 bias on
    # the padded columns so they contribute exactly 0 to the softmax.
    w4 = jnp.zeros((HIDDEN, PAD_OUT), bf16).at[:, :out_size].set(
        params["w4"].astype(bf16))
    b4 = jnp.full((1, PAD_OUT), NEG_BIG, jnp.float32).at[:, :out_size].set(
        params["b4"])

    inputs = (
        x, rnd,
        w1, params["b1"], params["g1"], params["be1"],
        w2, params["b2"], params["g2"], params["be2"],
        w3, params["b3"], params["g3"], params["be3"],
        w4, b4,
    )

    vmem = pl.BlockSpec(memory_space=pltpu.MemorySpace.VMEM)
    out_pad = pl.pallas_call(
        dnn_kernel,
        out_shape=jax.ShapeDtypeStruct((B, PAD_OUT), jnp.float32),
        in_specs=[vmem] * len(inputs),
        out_specs=vmem,
    )(*inputs)

    return out_pad[:, :out_size]


def init_params(key, input_size, output_size):
    """Deterministic synthetic parameters matching the module's shapes (f32)."""
    keys = jax.random.split(key, 8)

    def linear(kw, kb, fan_in, fan_out):
        bound = 1.0 / jnp.sqrt(float(fan_in))
        # stored as (in, out) == PyTorch weight (out, in) transposed
        w = jax.random.uniform(kw, (fan_in, fan_out), jnp.float32, -bound, bound)
        b = jax.random.uniform(kb, (1, fan_out), jnp.float32, -bound, bound)
        return w, b

    w1, b1 = linear(keys[0], keys[1], input_size, HIDDEN)
    w2, b2 = linear(keys[2], keys[3], HIDDEN, HIDDEN)
    w3, b3 = linear(keys[4], keys[5], HIDDEN, HIDDEN)
    w4, b4 = linear(keys[6], keys[7], HIDDEN, output_size)

    ones = jnp.ones((1, HIDDEN), jnp.float32)    # BatchNorm1d default weight
    zeros = jnp.zeros((1, HIDDEN), jnp.float32)  # BatchNorm1d default bias

    return dict(
        w1=w1, b1=b1, g1=ones, be1=zeros,
        w2=w2, b2=b2, g2=ones, be2=zeros,
        w3=w3, b3=b3, g3=ones, be3=zeros,
        w4=w4, b4=b4,
    )


if __name__ == "__main__":
    input_size = 32
    output_size = 4
    batch = 8

    key = jax.random.PRNGKey(0)
    k_x, k_p, k_drop = jax.random.split(key, 3)

    x = jax.random.normal(k_x, (batch, input_size), dtype=jnp.float32)
    params = init_params(k_p, input_size, output_size)

    out = dnn_forward(x, params, k_drop)
    out = jax.block_until_ready(out)

    assert out.shape == (batch, output_size)
    assert bool(jnp.all(jnp.isfinite(out)))
    # softmax rows sum to 1 (pad columns contribute exactly 0)
    assert bool(jnp.allclose(jnp.sum(out, axis=1), 1.0, atol=1e-3))

    print("KERNEL_OK")
</pallas_src>

<mosaic_0001>
module attributes {stable_mosaic.version = 11 : i64} {
  func.func @dnn_kernel(%arg0: memref<8x32xf32, #tpu.memory_space<vmem>>, %arg1: memref<3x8x256xi32, #tpu.memory_space<vmem>>, %arg2: memref<32x256xbf16, #tpu.memory_space<vmem>>, %arg3: memref<1x256xf32, #tpu.memory_space<vmem>>, %arg4: memref<1x256xf32, #tpu.memory_space<vmem>>, %arg5: memref<1x256xf32, #tpu.memory_space<vmem>>, %arg6: memref<256x256xbf16, #tpu.memory_space<vmem>>, %arg7: memref<1x256xf32, #tpu.memory_space<vmem>>, %arg8: memref<1x256xf32, #tpu.memory_space<vmem>>, %arg9: memref<1x256xf32, #tpu.memory_space<vmem>>, %arg10: memref<256x256xbf16, #tpu.memory_space<vmem>>, %arg11: memref<1x256xf32, #tpu.memory_space<vmem>>, %arg12: memref<1x256xf32, #tpu.memory_space<vmem>>, %arg13: memref<1x256xf32, #tpu.memory_space<vmem>>, %arg14: memref<256x128xbf16, #tpu.memory_space<vmem>>, %arg15: memref<1x128xf32, #tpu.memory_space<vmem>>, %arg16: memref<8x128xf32, #tpu.memory_space<vmem>>) attributes {dimension_semantics = [], scalar_prefetch = 0 : i64, scratch_operands = 0 : i64, tpu.core_type = #tpu.core_type<tc>} {
    %c0 = arith.constant 0 : index
    %c0_0 = arith.constant 0 : index
    %0 = vector.load %arg0[%c0, %c0_0] : memref<8x32xf32, #tpu.memory_space<vmem>>, vector<8x32xf32>
    %c0_1 = arith.constant 0 : index
    %c0_2 = arith.constant 0 : index
    %c0_3 = arith.constant 0 : index
    %1 = vector.load %arg1[%c0_1, %c0_2, %c0_3] : memref<3x8x256xi32, #tpu.memory_space<vmem>>, vector<1x8x256xi32>
    %2 = vector.shape_cast %1 : vector<1x8x256xi32> to vector<8x256xi32>
    %3 = arith.truncf %0 : vector<8x32xf32> to vector<8x32xbf16>
    %c0_4 = arith.constant 0 : index
    %c0_5 = arith.constant 0 : index
    %4 = vector.load %arg2[%c0_4, %c0_5] : memref<32x256xbf16, #tpu.memory_space<vmem>>, vector<32x256xbf16>
    %cst = arith.constant dense<0.000000e+00> : vector<8x256xf32>
    %5 = tpu.matmul %3, %4, %cst {dimension_numbers = #tpu.dot_dimension_numbers<[1], [0], [0], [1], [0, 0, 1, 1], [], []>} : vector<8x32xbf16>, vector<32x256xbf16>, vector<8x256xf32> -> vector<8x256xf32>
    %c0_6 = arith.constant 0 : index
    %c0_7 = arith.constant 0 : index
    %6 = vector.load %arg3[%c0_6, %c0_7] : memref<1x256xf32, #tpu.memory_space<vmem>>, vector<1x256xf32>
    %7 = vector.broadcast %6 : vector<1x256xf32> to vector<8x256xf32>
    %8 = arith.addf %5, %7 : vector<8x256xf32>
    %cst_8 = arith.constant 0.000000e+00 : f32
    %9 = vector.broadcast %cst_8 : f32 to vector<8x256xf32>
    %10 = arith.maximumf %8, %9 : vector<8x256xf32>
    %cst_9 = arith.constant dense<0.000000e+00> : vector<256xf32>
    %11 = vector.multi_reduction <add>, %10, %cst_9 [0] : vector<8x256xf32> to vector<256xf32>
    %12 = vector.shape_cast %11 : vector<256xf32> to vector<1x256xf32>
    %cst_10 = arith.constant 1.250000e-01 : f32
    %13 = vector.broadcast %cst_10 : f32 to vector<1x256xf32>
    %14 = arith.mulf %12, %13 : vector<1x256xf32>
    %15 = arith.mulf %10, %10 : vector<8x256xf32>
    %cst_11 = arith.constant dense<0.000000e+00> : vector<256xf32>
    %16 = vector.multi_reduction <add>, %15, %cst_11 [0] : vector<8x256xf32> to vector<256xf32>
    %17 = vector.shape_cast %16 : vector<256xf32> to vector<1x256xf32>
    %cst_12 = arith.constant 1.250000e-01 : f32
    %18 = vector.broadcast %cst_12 : f32 to vector<1x256xf32>
    %19 = arith.mulf %17, %18 : vector<1x256xf32>
    %20 = arith.mulf %14, %14 : vector<1x256xf32>
    %21 = arith.subf %19, %20 : vector<1x256xf32>
    %cst_13 = arith.constant 0.000000e+00 : f32
    %22 = vector.broadcast %cst_13 : f32 to vector<1x256xf32>
    %23 = arith.maximumf %21, %22 : vector<1x256xf32>
    %c0_14 = arith.constant 0 : index
    %c0_15 = arith.constant 0 : index
    %24 = vector.load %arg4[%c0_14, %c0_15] : memref<1x256xf32, #tpu.memory_space<vmem>>, vector<1x256xf32>
    %cst_16 = arith.constant 9.99999974E-6 : f32
    %25 = vector.broadcast %cst_16 : f32 to vector<1x256xf32>
    %26 = arith.addf %23, %25 : vector<1x256xf32>
    %27 = math.rsqrt %26 : vector<1x256xf32>
    %28 = arith.mulf %24, %27 : vector<1x256xf32>
    %c0_17 = arith.constant 0 : index
    %c0_18 = arith.constant 0 : index
    %29 = vector.load %arg5[%c0_17, %c0_18] : memref<1x256xf32, #tpu.memory_space<vmem>>, vector<1x256xf32>
    %30 = arith.mulf %14, %28 : vector<1x256xf32>
    %31 = arith.subf %29, %30 : vector<1x256xf32>
    %32 = vector.broadcast %28 : vector<1x256xf32> to vector<8x256xf32>
    %33 = arith.mulf %10, %32 : vector<8x256xf32>
    %34 = vector.broadcast %31 : vector<1x256xf32> to vector<8x256xf32>
    %35 = arith.addf %33, %34 : vector<8x256xf32>
    %c0_i32 = arith.constant 0 : i32
    %36 = vector.broadcast %c0_i32 : i32 to vector<8x256xi32>
    %37 = arith.cmpi slt, %2, %36 : vector<8x256xi32>
    %cst_19 = arith.constant 2.000000e+00 : f32
    %cst_20 = arith.constant 0.000000e+00 : f32
    %38 = vector.broadcast %cst_19 : f32 to vector<8x256xf32>
    %39 = vector.broadcast %cst_20 : f32 to vector<8x256xf32>
    %40 = arith.select %37, %38, %39 : vector<8x256xi1>, vector<8x256xf32>
    %41 = arith.mulf %35, %40 : vector<8x256xf32>
    %c1 = arith.constant 1 : index
    %c0_21 = arith.constant 0 : index
    %c0_22 = arith.constant 0 : index
    %42 = vector.load %arg1[%c1, %c0_21, %c0_22] : memref<3x8x256xi32, #tpu.memory_space<vmem>>, vector<1x8x256xi32>
    %43 = vector.shape_cast %42 : vector<1x8x256xi32> to vector<8x256xi32>
    %44 = arith.truncf %41 : vector<8x256xf32> to vector<8x256xbf16>
    %c0_23 = arith.constant 0 : index
    %c0_24 = arith.constant 0 : index
    %45 = vector.load %arg6[%c0_23, %c0_24] : memref<256x256xbf16, #tpu.memory_space<vmem>>, vector<256x256xbf16>
    %cst_25 = arith.constant dense<0.000000e+00> : vector<8x256xf32>
    %46 = tpu.matmul %44, %45, %cst_25 {dimension_numbers = #tpu.dot_dimension_numbers<[1], [0], [0], [1], [0, 0, 1, 1], [], []>} : vector<8x256xbf16>, vector<256x256xbf16>, vector<8x256xf32> -> vector<8x256xf32>
    %c0_26 = arith.constant 0 : index
    %c0_27 = arith.constant 0 : index
    %47 = vector.load %arg7[%c0_26, %c0_27] : memref<1x256xf32, #tpu.memory_space<vmem>>, vector<1x256xf32>
    %48 = vector.broadcast %47 : vector<1x256xf32> to vector<8x256xf32>
    %49 = arith.addf %46, %48 : vector<8x256xf32>
    %cst_28 = arith.constant 0.000000e+00 : f32
    %50 = vector.broadcast %cst_28 : f32 to vector<8x256xf32>
    %51 = arith.maximumf %49, %50 : vector<8x256xf32>
    %cst_29 = arith.constant dense<0.000000e+00> : vector<256xf32>
    %52 = vector.multi_reduction <add>, %51, %cst_29 [0] : vector<8x256xf32> to vector<256xf32>
    %53 = vector.shape_cast %52 : vector<256xf32> to vector<1x256xf32>
    %cst_30 = arith.constant 1.250000e-01 : f32
    %54 = vector.broadcast %cst_30 : f32 to vector<1x256xf32>
    %55 = arith.mulf %53, %54 : vector<1x256xf32>
    %56 = arith.mulf %51, %51 : vector<8x256xf32>
    %cst_31 = arith.constant dense<0.000000e+00> : vector<256xf32>
    %57 = vector.multi_reduction <add>, %56, %cst_31 [0] : vector<8x256xf32> to vector<256xf32>
    %58 = vector.shape_cast %57 : vector<256xf32> to vector<1x256xf32>
    %cst_32 = arith.constant 1.250000e-01 : f32
    %59 = vector.broadcast %cst_32 : f32 to vector<1x256xf32>
    %60 = arith.mulf %58, %59 : vector<1x256xf32>
    %61 = arith.mulf %55, %55 : vector<1x256xf32>
    %62 = arith.subf %60, %61 : vector<1x256xf32>
    %cst_33 = arith.constant 0.000000e+00 : f32
    %63 = vector.broadcast %cst_33 : f32 to vector<1x256xf32>
    %64 = arith.maximumf %62, %63 : vector<1x256xf32>
    %c0_34 = arith.constant 0 : index
    %c0_35 = arith.constant 0 : index
    %65 = vector.load %arg8[%c0_34, %c0_35] : memref<1x256xf32, #tpu.memory_space<vmem>>, vector<1x256xf32>
    %cst_36 = arith.constant 9.99999974E-6 : f32
    %66 = vector.broadcast %cst_36 : f32 to vector<1x256xf32>
    %67 = arith.addf %64, %66 : vector<1x256xf32>
    %68 = math.rsqrt %67 : vector<1x256xf32>
    %69 = arith.mulf %65, %68 : vector<1x256xf32>
    %c0_37 = arith.constant 0 : index
    %c0_38 = arith.constant 0 : index
    %70 = vector.load %arg9[%c0_37, %c0_38] : memref<1x256xf32, #tpu.memory_space<vmem>>, vector<1x256xf32>
    %71 = arith.mulf %55, %69 : vector<1x256xf32>
    %72 = arith.subf %70, %71 : vector<1x256xf32>
    %73 = vector.broadcast %69 : vector<1x256xf32> to vector<8x256xf32>
    %74 = arith.mulf %51, %73 : vector<8x256xf32>
    %75 = vector.broadcast %72 : vector<1x256xf32> to vector<8x256xf32>
    %76 = arith.addf %74, %75 : vector<8x256xf32>
    %c0_i32_39 = arith.constant 0 : i32
    %77 = vector.broadcast %c0_i32_39 : i32 to vector<8x256xi32>
    %78 = arith.cmpi slt, %43, %77 : vector<8x256xi32>
    %cst_40 = arith.constant 2.000000e+00 : f32
    %cst_41 = arith.constant 0.000000e+00 : f32
    %79 = vector.broadcast %cst_40 : f32 to vector<8x256xf32>
    %80 = vector.broadcast %cst_41 : f32 to vector<8x256xf32>
    %81 = arith.select %78, %79, %80 : vector<8x256xi1>, vector<8x256xf32>
    %82 = arith.mulf %76, %81 : vector<8x256xf32>
    %c2 = arith.constant 2 : index
    %c0_42 = arith.constant 0 : index
    %c0_43 = arith.constant 0 : index
    %83 = vector.load %arg1[%c2, %c0_42, %c0_43] : memref<3x8x256xi32, #tpu.memory_space<vmem>>, vector<1x8x256xi32>
    %84 = vector.shape_cast %83 : vector<1x8x256xi32> to vector<8x256xi32>
    %85 = arith.truncf %82 : vector<8x256xf32> to vector<8x256xbf16>
    %c0_44 = arith.constant 0 : index
    %c0_45 = arith.constant 0 : index
    %86 = vector.load %arg10[%c0_44, %c0_45] : memref<256x256xbf16, #tpu.memory_space<vmem>>, vector<256x256xbf16>
    %cst_46 = arith.constant dense<0.000000e+00> : vector<8x256xf32>
    %87 = tpu.matmul %85, %86, %cst_46 {dimension_numbers = #tpu.dot_dimension_numbers<[1], [0], [0], [1], [0, 0, 1, 1], [], []>} : vector<8x256xbf16>, vector<256x256xbf16>, vector<8x256xf32> -> vector<8x256xf32>
    %c0_47 = arith.constant 0 : index
    %c0_48 = arith.constant 0 : index
    %88 = vector.load %arg11[%c0_47, %c0_48] : memref<1x256xf32, #tpu.memory_space<vmem>>, vector<1x256xf32>
    %89 = vector.broadcast %88 : vector<1x256xf32> to vector<8x256xf32>
    %90 = arith.addf %87, %89 : vector<8x256xf32>
    %cst_49 = arith.constant 0.000000e+00 : f32
    %91 = vector.broadcast %cst_49 : f32 to vector<8x256xf32>
    %92 = arith.maximumf %90, %91 : vector<8x256xf32>
    %cst_50 = arith.constant dense<0.000000e+00> : vector<256xf32>
    %93 = vector.multi_reduction <add>, %92, %cst_50 [0] : vector<8x256xf32> to vector<256xf32>
    %94 = vector.shape_cast %93 : vector<256xf32> to vector<1x256xf32>
    %cst_51 = arith.constant 1.250000e-01 : f32
    %95 = vector.broadcast %cst_51 : f32 to vector<1x256xf32>
    %96 = arith.mulf %94, %95 : vector<1x256xf32>
    %97 = arith.mulf %92, %92 : vector<8x256xf32>
    %cst_52 = arith.constant dense<0.000000e+00> : vector<256xf32>
    %98 = vector.multi_reduction <add>, %97, %cst_52 [0] : vector<8x256xf32> to vector<256xf32>
    %99 = vector.shape_cast %98 : vector<256xf32> to vector<1x256xf32>
    %cst_53 = arith.constant 1.250000e-01 : f32
    %100 = vector.broadcast %cst_53 : f32 to vector<1x256xf32>
    %101 = arith.mulf %99, %100 : vector<1x256xf32>
    %102 = arith.mulf %96, %96 : vector<1x256xf32>
    %103 = arith.subf %101, %102 : vector<1x256xf32>
    %cst_54 = arith.constant 0.000000e+00 : f32
    %104 = vector.broadcast %cst_54 : f32 to vector<1x256xf32>
    %105 = arith.maximumf %103, %104 : vector<1x256xf32>
    %c0_55 = arith.constant 0 : index
    %c0_56 = arith.constant 0 : index
    %106 = vector.load %arg12[%c0_55, %c0_56] : memref<1x256xf32, #tpu.memory_space<vmem>>, vector<1x256xf32>
    %cst_57 = arith.constant 9.99999974E-6 : f32
    %107 = vector.broadcast %cst_57 : f32 to vector<1x256xf32>
    %108 = arith.addf %105, %107 : vector<1x256xf32>
    %109 = math.rsqrt %108 : vector<1x256xf32>
    %110 = arith.mulf %106, %109 : vector<1x256xf32>
    %c0_58 = arith.constant 0 : index
    %c0_59 = arith.constant 0 : index
    %111 = vector.load %arg13[%c0_58, %c0_59] : memref<1x256xf32, #tpu.memory_space<vmem>>, vector<1x256xf32>
    %112 = arith.mulf %96, %110 : vector<1x256xf32>
    %113 = arith.subf %111, %112 : vector<1x256xf32>
    %114 = vector.broadcast %110 : vector<1x256xf32> to vector<8x256xf32>
    %115 = arith.mulf %92, %114 : vector<8x256xf32>
    %116 = vector.broadcast %113 : vector<1x256xf32> to vector<8x256xf32>
    %117 = arith.addf %115, %116 : vector<8x256xf32>
    %c0_i32_60 = arith.constant 0 : i32
    %118 = vector.broadcast %c0_i32_60 : i32 to vector<8x256xi32>
    %119 = arith.cmpi slt, %84, %118 : vector<8x256xi32>
    %cst_61 = arith.constant 2.000000e+00 : f32
    %cst_62 = arith.constant 0.000000e+00 : f32
    %120 = vector.broadcast %cst_61 : f32 to vector<8x256xf32>
    %121 = vector.broadcast %cst_62 : f32 to vector<8x256xf32>
    %122 = arith.select %119, %120, %121 : vector<8x256xi1>, vector<8x256xf32>
    %123 = arith.mulf %117, %122 : vector<8x256xf32>
    %124 = arith.truncf %123 : vector<8x256xf32> to vector<8x256xbf16>
    %c0_63 = arith.constant 0 : index
    %c0_64 = arith.constant 0 : index
    %125 = vector.load %arg14[%c0_63, %c0_64] : memref<256x128xbf16, #tpu.memory_space<vmem>>, vector<256x128xbf16>
    %cst_65 = arith.constant dense<0.000000e+00> : vector<8x128xf32>
    %126 = tpu.matmul %124, %125, %cst_65 {dimension_numbers = #tpu.dot_dimension_numbers<[1], [0], [0], [1], [0, 0, 1, 1], [], []>} : vector<8x256xbf16>, vector<256x128xbf16>, vector<8x128xf32> -> vector<8x128xf32>
    %c0_66 = arith.constant 0 : index
    %c0_67 = arith.constant 0 : index
    %127 = vector.load %arg15[%c0_66, %c0_67] : memref<1x128xf32, #tpu.memory_space<vmem>>, vector<1x128xf32>
    %128 = vector.broadcast %127 : vector<1x128xf32> to vector<8x128xf32>
    %129 = arith.addf %126, %128 : vector<8x128xf32>
    %cst_68 = arith.constant dense<0xFF800000> : vector<8xf32>
    %130 = vector.multi_reduction <maximumf>, %129, %cst_68 [1] : vector<8x128xf32> to vector<8xf32>
    %131 = vector.shape_cast %130 : vector<8xf32> to vector<8x1xf32>
    %132 = vector.broadcast %131 : vector<8x1xf32> to vector<8x128xf32>
    %133 = arith.subf %129, %132 : vector<8x128xf32>
    %134 = math.exp %133 : vector<8x128xf32>
    %cst_69 = arith.constant dense<0.000000e+00> : vector<8xf32>
    %135 = vector.multi_reduction <add>, %134, %cst_69 [1] : vector<8x128xf32> to vector<8xf32>
    %136 = vector.shape_cast %135 : vector<8xf32> to vector<8x1xf32>
    %137 = vector.broadcast %136 : vector<8x1xf32> to vector<8x128xf32>
    %138 = arith.divf %134, %137 : vector<8x128xf32>
    %c0_70 = arith.constant 0 : index
    %c0_71 = arith.constant 0 : index
    %139 = vector.load %arg16[%c0_70, %c0_71] : memref<8x128xf32, #tpu.memory_space<vmem>>, vector<8x128xf32>
    tpu.vector_store %arg16[%c0_70, %c0_71], %138 {strides = array<i32>} : memref<8x128xf32, #tpu.memory_space<vmem>>, vector<8x128xf32>,
    return
  }
}

</mosaic_0001>

<bundles_post_ra>
// kernel: tpu_custom_call.1
= control target key start
LH: loop header
LB: loop body
LE: loop exit
PB: predicated region body
PF: predicated region fallthrough
CT: control target
= control target key end

     0   :  { %s2199_s0 = inlined_call_operand.hbm [shape: f32[8,32], index: 0, kind: input, shape index: {}]   ;;  %s2200_s1 = inlined_call_operand.hbm [shape: s32[3,8,256], index: 1, kind: input, shape index: {}]   ;;  %s2201_s2 = inlined_call_operand.hbm [shape: bf16[32,256], index: 2, kind: input, shape index: {}]   ;;  %s2202_s3 = inlined_call_operand.vmem [shape: f32[1,256], index: 3, kind: input, shape index: {}]   ;;  %s2203_s4 = inlined_call_operand.hbm [shape: f32[1,256], index: 4, kind: input, shape index: {}]   ;;  %s2204_s5 = inlined_call_operand.vmem [shape: f32[1,256], index: 5, kind: input, shape index: {}]   ;;  %s2205_s6 = inlined_call_operand.hbm [shape: bf16[256,256], index: 6, kind: input, shape index: {}]   ;;  %s2206_s7 = inlined_call_operand.vmem [shape: f32[1,256], index: 7, kind: input, shape index: {}]   ;;  %s2207_s8 = inlined_call_operand.hbm [shape: f32[1,256], index: 8, kind: input, shape index: {}]   ;;  %s2208_s9 = inlined_call_operand.vmem [shape: f32[1,256], index: 9, kind: input, shape index: {}]   ;;  %s2209_s10 = inlined_call_operand.hbm [shape: bf16[256,256], index: 10, kind: input, shape index: {}]   ;;  %s2210_s11 = inlined_call_operand.vmem [shape: f32[1,256], index: 11, kind: input, shape index: {}]   ;;  %s2211_s12 = inlined_call_operand.hbm [shape: f32[1,256], index: 12, kind: input, shape index: {}]   ;;  %s2212_s13 = inlined_call_operand.vmem [shape: f32[1,256], index: 13, kind: input, shape index: {}]   ;;  %s2213_s14 = inlined_call_operand.hbm [shape: bf16[256,128], index: 14, kind: input, shape index: {}]   ;;  %s2214_s15 = inlined_call_operand.vmem [shape: f32[1,128], index: 15, kind: input, shape index: {}]   ;;  %s2215_s16 = inlined_call_operand.hbm [shape: f32[8,128], index: 16, kind: output, shape index: {}]  }
   0x1   :  { %2216 = sst [smem:[#allocation24_spill]] %s2199_s0 }
   0x2   :  { %21 = vsyncpa [#allocation3], 0 }
   0x3   :  { %22 = vsyncpa [#allocation6], 0 }
   0x4   :  { %23 = vsyncpa [#allocation9], 0 }
   0x5   :  { %24 = vsyncpa [#allocation12], 0 }
   0x6   :  { %25 = vsyncpa [#allocation15], 0  ;;  %s42_s23 = sshll.u32 %s2200_s1, 4  ;;  %s43_s23 = int_to_ptr.hbm [resolvable:$true] %s42_s23 }
   0x7   :  { %26 = vsyncpa [#allocation4], 0  ;;  %s1962_s24 = smov [#allocation5]   ;;  %s71_s28 = sshll.u32 %s2203_s4, 4  ;;  %s72_s28 = int_to_ptr.hbm [resolvable:$true] %s71_s28 }
   0x8   :  { %s44_s25 = sshll.u32 %s1962_s24, 4  ;;  %s1963_s29 = smov 256   ;;  %s45_s25 = int_to_ptr.vmem [resolvable:$true] %s44_s25 }
   0x9   :  { %s1964_s30 = smov 16   ;;  %s1965_s0 = smov [#allocation8]  }
   0xa   :  { %50 = dma.hbm_to_vmem [thread:$0]  %s43_s23, 768, %s45_s25, [#allocation6], %s1963_s29, %s1963_s29, %s1964_s30  }
   0xb   :  { %s73_s17 = sshll.u32 %s1965_s0, 4  ;;  %s99_s20 = sshll.u32 %s2207_s8, 4  ;;  %s74_s17 = int_to_ptr.vmem [resolvable:$true] %s73_s17  ;;  %s100_s20 = int_to_ptr.hbm [resolvable:$true] %s99_s20 }
   0xc   :  { %76 = dma.hbm_to_vmem [thread:$0]  %s72_s28, 32, %s74_s17, [#allocation9]  }
   0xd   :  { %s127_s22 = sshll.u32 %s2211_s12, 4  ;;  %s1966_s24 = smov [#allocation11]   ;;  %s128_s22 = int_to_ptr.hbm [resolvable:$true] %s127_s22 }
   0xe   :  { %s101_s26 = sshll.u32 %s1966_s24, 4  ;;  %s1967_s4 = smov [#allocation14]   ;;  %s102_s26 = int_to_ptr.vmem [resolvable:$true] %s101_s26 }
   0xf   :  { %104 = dma.hbm_to_vmem [thread:$0]  %s100_s20, 32, %s102_s26, [#allocation12]  }
  0x10   :  { %s129_s23 = sshll.u32 %s1967_s4, 4  ;;  %s2217_s29 = sld [smem:[#allocation24_spill]]  ;;  %s130_s23 = int_to_ptr.vmem [resolvable:$true] %s129_s23 }
  0x11   :  { %132 = dma.hbm_to_vmem [thread:$0]  %s128_s22, 32, %s130_s23, [#allocation15]  }
  0x12   :  { %s55_s0 = sshll.u32 %s2201_s2, 4  ;;  %s1968_s17 = smov [#allocation2]   ;;  %s56_s0 = int_to_ptr.hbm [resolvable:$true] %s55_s0 }
  0x13   :  { %s34_s12 = sshll.u32 %s1968_s17, 4  ;;  %s1969_s18 = smov [#allocation7]   ;;  %s35_s12 = int_to_ptr.vmem [resolvable:$true] %s34_s12 }
  0x14   :  { %s57_s19 = sshll.u32 %s1969_s18, 4  ;;  %s1970_s20 = smov 128   ;;  %s58_s19 = int_to_ptr.vmem [resolvable:$true] %s57_s19 }
  0x15   :  { %s1971_s1 = smov 8   ;;  %s83_s26 = sshll.u32 %s2205_s6, 4  ;;  %s84_s26 = int_to_ptr.hbm [resolvable:$true] %s83_s26 }
  0x16   :  { %s32_s30 = sshll.u32 %s2217_s29, 4  ;;  %s1972_s22 = smov [#allocation10]   ;;  %s33_s30 = int_to_ptr.hbm [resolvable:$true] %s32_s30 }
  0x17   :  { %37 = dma.hbm_to_vmem [thread:$0]  %s33_s30, 128, %s35_s12, [#allocation3]  }
  0x18   :  { %63 = dma.hbm_to_vmem [thread:$0]  %s56_s0, 512, %s58_s19, [#allocation6], %s1970_s20, %s1970_s20, %s1971_s1  }
  0x19   :  { %s85_s4 = sshll.u32 %s1972_s22, 4  ;;  %s111_s25 = sshll.u32 %s2209_s10, 4  ;;  %s86_s4 = int_to_ptr.vmem [resolvable:$true] %s85_s4  ;;  %s112_s25 = int_to_ptr.hbm [resolvable:$true] %s111_s25 }
  0x1a   :  { %91 = dma.hbm_to_vmem [thread:$0]  %s84_s26, 4096, %s86_s4, [#allocation9], %s1970_s20, %s1970_s20, %s1971_s1  }
  0x1b   :  { %s1973_s27 = smov [#allocation13]   ;;  %s139_s28 = sshll.u32 %s2213_s14, 4  ;;  %s140_s28 = int_to_ptr.hbm [resolvable:$true] %s139_s28 }
  0x1c   :  { %s113_s29 = sshll.u32 %s1973_s27, 4  ;;  %s1974_s6 = smov [#allocation16]   ;;  %s114_s29 = int_to_ptr.vmem [resolvable:$true] %s113_s29 }
  0x1d   :  { %119 = dma.hbm_to_vmem [thread:$0]  %s112_s25, 4096, %s114_s29, [#allocation12], %s1970_s20, %s1970_s20, %s1971_s1  }
  0x1e   :  { %s141_s0 = sshll.u32 %s1974_s6, 4  ;;  %s1975_s17 = smov 64   ;;  %s142_s0 = int_to_ptr.vmem [resolvable:$true] %s141_s0 }
  0x1f   :  { %s1976_s12 = smov 4  }
  0x20   :  { %147 = dma.hbm_to_vmem [thread:$0]  %s140_s28, 2048, %s142_s0, [#allocation15], %s1975_s17, %s1975_s17, %s1976_s12  }
  0x21   :  { %1950 = dma.done.wait [#allocation3], 128  }
  0x22   :  { %1951 = vsyncadd [#allocation3], 4294967168 }
  0x23   :  { %1952 = dma.done.wait [#allocation6], 1280  }
  0x24   :  { %1953 = vsyncadd [#allocation6], 4294966016 }
  0x25   :  { %1954 = dma.done.wait [#allocation9], 4128  }
  0x26   :  { %1955 = vsyncadd [#allocation9], 4294963168 }
  0x27   :  { %1956 = dma.done.wait [#allocation12], 4128  }
  0x28   :  { %1957 = vsyncadd [#allocation12], 4294963168 }
  0x29   :  { %1958 = dma.done.wait [#allocation15], 2080  }
  0x2a   :  { %1959 = vsyncadd [#allocation15], 4294965216  ;;  %v1264_v0 = vld [vmem:[#allocation7 + $0x10] sm:$0xf]  ;;  %v1595_v1 = vld [vmem:[#allocation7 + $0x14] sm:$0xf0] }
  0x2b   :  { %v1594_v2 = vld [vmem:[#allocation7 + $0x14] sm:$0xf]  ;;  %v1265_v3 = vor.u32 %v1595_v1, %v1264_v0  ;;  %v1266_v4 = vld [vmem:[#allocation7 + $0x18] sm:$0xf0]  ;;  %v1256_v5 = vld [vmem:[#allocation7] sm:$0xf] }
  0x2c   :  { %v1593_v6 = vld [vmem:[#allocation7 + $0x4] sm:$0xf0]  ;;  %v1269_v7 = vor.u32 %v1594_v2, %v1266_v4  ;;  %v1592_v8 = vld [vmem:[#allocation7 + $0x4] sm:$0xf]  ;;  %v1258_v9 = vld [vmem:[#allocation7 + $0x8] sm:$0xf0] }
  0x2d   :  { %231 = vmatpush.bf16.msra.mxu0 %v1265_v3  ;;  %v1257_v10 = vor.u32 %v1593_v6, %v1256_v5  ;;  %v187_v11 = vld [vmem:[#allocation2] sm:$0xff]  ;;  %v1261_v12 = vor.u32 %v1592_v8, %v1258_v9  ;;  %vm221_vm0 = vcmask 261120   ;;  %v1330_v21 = vld [vmem:[#allocation10 + $0x70] sm:$0xf]  ;;  %v1611_v22 = vld [vmem:[#allocation10 + $0x74] sm:$0xf0] }
  0x2e   :  { %244 = vmatpush.bf16.msra.mxu1 %v1269_v7  ;;  %v190_v13 = vpack.c.bf16 %v187_v11, %v187_v11  ;;  %v195_v14 = vld [vmem:[%s2202_s3] sm:$0x3]  ;;  %v1394_v23 = vld [vmem:[#allocation10 + $0xf0] sm:$0xf]  ;;  %v1331_v25 = vor.u32 %v1611_v22, %v1330_v21  ;;  %v1627_v26 = vld [vmem:[#allocation10 + $0xf4] sm:$0xf0] }
  0x2f   :  { %v197_v15 = vperm.slane %v195_v14, 0  ;;  %v198_v16 = vperm.slane %v195_v14, 1  ;;  %v1610_v27 = vld [vmem:[#allocation10 + $0x74] sm:$0xf]  ;;  %v1395_v29 = vor.u32 %v1627_v26, %v1394_v23  ;;  %v1332_v30 = vld [vmem:[#allocation10 + $0x78] sm:$0xf0] }
  0x30   :  { %v1626_v31 = vld [vmem:[#allocation10 + $0xf4] sm:$0xf]  ;;  %551 = vmatpush.bf16.msra.mxu2 %v1331_v25  ;;  %v1335_v34 = vor.u32 %v1610_v27, %v1332_v30  ;;  %v1396_v35 = vld [vmem:[#allocation10 + $0xf8] sm:$0xf0]  ;;  %v1322_v36 = vld [vmem:[#allocation10 + $0x60] sm:$0xf] }
  0x31   :  { %232 = vmatpush.bf16.msra.mxu0 %v1257_v10  ;;  %564 = vmatpush.bf16.msra.mxu3 %v1395_v29  ;;  %v1399_v39 = vor.u32 %v1626_v31, %v1396_v35  ;;  %v1609_v40 = vld [vmem:[#allocation10 + $0x64] sm:$0xf0]  ;;  %v1386_v41 = vld [vmem:[#allocation10 + $0xe0] sm:$0xf]  ;;  %v1608_v46 = vld [vmem:[#allocation10 + $0x64] sm:$0xf] }
  0x32   :  { %245 = vmatpush.bf16.msra.mxu1 %v1261_v12  ;;  %v1323_v44 = vor.u32 %v1609_v40, %v1322_v36  ;;  %v1625_v45 = vld [vmem:[#allocation10 + $0xe4] sm:$0xf0]  ;;  %v1324_v51 = vld [vmem:[#allocation10 + $0x68] sm:$0xf0]  ;;  %v1624_v52 = vld [vmem:[#allocation10 + $0xe4] sm:$0xf] }
  0x33   :  { %v1387_v50 = vor.u32 %v1625_v45, %v1386_v41  ;;  %v1327_v56 = vor.u32 %v1608_v46, %v1324_v51  ;;  %v1388_v57 = vld [vmem:[#allocation10 + $0xe8] sm:$0xf0]  ;;  %v1314_v58 = vld [vmem:[#allocation10 + $0x50] sm:$0xf]  ;;  %v1607_v62 = vld [vmem:[#allocation10 + $0x54] sm:$0xf0] }
  0x34   :  { %1270 = vmatmul.msk.bf16.vlgmr.msra.gmra.mxu0 %vm221_vm0, %v190_v13  ;;  %552 = vmatpush.bf16.msra.mxu2 %v1323_v44  ;;  %v1391_v61 = vor.u32 %v1624_v52, %v1388_v57  ;;  %v1378_v63 = vld [vmem:[#allocation10 + $0xd0] sm:$0xf]  ;;  %v1315_v2 = vor.u32 %v1607_v62, %v1314_v58  ;;  %v1623_v3 = vld [vmem:[#allocation10 + $0xd4] sm:$0xf0]  ;;  %v1606_v4 = vld [vmem:[#allocation10 + $0x54] sm:$0xf] }
  0x35   :  { %1271 = vmatmul.msk.bf16.vlgmr.msra.gmra.mxu1 %vm221_vm0, %v190_v13  ;;  %577 = vmatpush.bf16.msrb.mxu0 %v1335_v34  ;;  %v1379_v7 = vor.u32 %v1623_v3, %v1378_v63  ;;  %v1316_v8 = vld [vmem:[#allocation10 + $0x58] sm:$0xf0]  ;;  %v1622_v9 = vld [vmem:[#allocation10 + $0xd4] sm:$0xf]  ;;  %v1306_v14 = vld [vmem:[#allocation10 + $0x40] sm:$0xf] }
  0x36   :  { %590 = vmatpush.bf16.msrb.mxu1 %v1399_v39  ;;  %565 = vmatpush.bf16.msra.mxu3 %v1387_v50  ;;  %v1319_v12 = vor.u32 %v1606_v4, %v1316_v8  ;;  %v1380_v13 = vld [vmem:[#allocation10 + $0xd8] sm:$0xf0]  ;;  %v1621_v22 = vld [vmem:[#allocation10 + $0xc4] sm:$0xf0]  ;;  %v1604_v23 = vld [vmem:[#allocation10 + $0x44] sm:$0xf] }
  0x37   :  { %v1308_v30 = vld [vmem:[#allocation10 + $0x48] sm:$0xf0]  ;;  %v1620_v31 = vld [vmem:[#allocation10 + $0xc4] sm:$0xf]  ;;  %v1298_v35 = vld [vmem:[#allocation10 + $0x30] sm:$0xf] }
  0x38   :  { %553 = vmatpush.bf16.msra.mxu2 %v1315_v2  ;;  %v1372_v34 = vld [vmem:[#allocation10 + $0xc8] sm:$0xf0]  ;;  %v1603_v36 = vld [vmem:[#allocation10 + $0x34] sm:$0xf0]  ;;  %v1362_v41 = vld [vmem:[#allocation10 + $0xb0] sm:$0xf] }
  0x39   :  { %578 = vmatpush.bf16.msrb.mxu0 %v1327_v56  ;;  %v1375_v39 = vor.u32 %v1620_v31, %v1372_v34  ;;  %v1299_v40 = vor.u32 %v1603_v36, %v1298_v35  ;;  %v1602_v44 = vld [vmem:[#allocation10 + $0x34] sm:$0xf]  ;;  %v1300_v45 = vld [vmem:[#allocation10 + $0x38] sm:$0xf0]  ;;  %v1354_v56 = vld [vmem:[#allocation10 + $0xa0] sm:$0xf] }
  0x3a   :  { %591 = vmatpush.bf16.msrb.mxu1 %v1391_v61  ;;  %566 = vmatpush.bf16.msra.mxu3 %v1379_v7  ;;  %v1303_v50 = vor.u32 %v1602_v44, %v1300_v45  ;;  %v1618_v51 = vld [vmem:[#allocation10 + $0xb4] sm:$0xf]  ;;  %v1364_v52 = vld [vmem:[#allocation10 + $0xb8] sm:$0xf0]  ;;  %v1600_v61 = vld [vmem:[#allocation10 + $0x24] sm:$0xf] }
  0x3b   :  { %v1292_v62 = vld [vmem:[#allocation10 + $0x28] sm:$0xf0]  ;;  %v1282_v3 = vld [vmem:[#allocation10 + $0x10] sm:$0xf]  ;;  %vm315_vm6 = vcmask 1040384   ;;  %s1240_s2 = sshll.u32 %s2215_s16, 4  ;;  %s1241_s2 = int_to_ptr.hbm [resolvable:$true] %s1240_s2 }
  0x3c   :  { %v1356_v2 = vld [vmem:[#allocation10 + $0xa8] sm:$0xf0]  ;;  %v1346_v7 = vld [vmem:[#allocation10 + $0x90] sm:$0xf] }
  0x3d   :  { %579 = vmatpush.bf16.msrb.mxu0 %v1319_v12 }
  0xb1   :  { %v234_v17 = vpop.f32.mrf.mxu0 }
  0xb2   :  { %v235_v18 = vadd.f32 %v234_v17, %v197_v15  ;;  %v247_v19 = vpop.f32.mrf.mxu1  ;;  %v1383_v17 = vor.u32 %v1622_v9, %v1380_v13  ;;  %v1615_v9 = vld [vmem:[#allocation10 + $0x94] sm:$0xf0] }
  0xb3   :  { %v248_v20 = vadd.f32 %v247_v19, %v198_v16  ;;  %v1370_v19 = vld [vmem:[#allocation10 + $0xc0] sm:$0xf] }
  0xb4   :  { %v2094_v24 = vmax.f32 %v235_v18, 0.0  ;;  %v1605_v18 = vld [vmem:[#allocation10 + $0x44] sm:$0xf0]  ;;  %592 = vmatpush.bf16.msrb.mxu1 %v1383_v17  ;;  %v1371_v29 = vor.u32 %v1621_v22, %v1370_v19 }
  0xb5   :  { %v2096_v28 = vmax.f32 %v248_v20, 0.0  ;;  %v1307_v21 = vor.u32 %v1605_v18, %v1306_v14  ;;  %v1347_v14 = vor.u32 %v1615_v9, %v1346_v7  ;;  %v1274_v18 = vld [vmem:[#allocation10] sm:$0xf]  ;;  %v1597_v19 = vld [vmem:[#allocation10 + $0x4] sm:$0xf0] }
  0xb6   :  { %v253_v32 = vrot.slane %v2094_v24, 4  ;;  %v267_v33 = vmul.f32 %v2094_v24, %v2094_v24  ;;  %567 = vmatpush.bf16.msra.mxu3 %v1371_v29  ;;  %v1613_v22 = vld [vmem:[#allocation10 + $0x84] sm:$0xf0]  ;;  %v1340_v29 = vld [vmem:[#allocation10 + $0x88] sm:$0xf0] }
  0xb7   :  { %v259_v37 = vrot.slane %v2096_v28, 4  ;;  %v268_v38 = vmul.f32 %v2096_v28, %v2096_v28  ;;  %554 = vmatpush.bf16.msra.mxu2 %v1307_v21 }
  0xb8   :  { %v254_v42 = vadd.f32 %v253_v32, %v2094_v24  ;;  %v269_v43 = vrot.slane %v267_v33, 4  ;;  %593 = vmatpush.bf16.msrb.mxu1 %v1375_v39 }
  0xb9   :  { %v260_v47 = vadd.f32 %v259_v37, %v2096_v28  ;;  %v275_v48 = vrot.slane %v268_v38, 4  ;;  %v236_v49 = vpop.f32.mrf.mxu0 }
  0xba   :  { %v255_v53 = vrot.slane %v254_v42, 2  ;;  %v270_v54 = vadd.f32 %v269_v43, %v267_v33  ;;  %v249_v55 = vpop.f32.mrf.mxu1  ;;  %v1311_v33 = vor.u32 %v1604_v23, %v1308_v30  ;;  %v1596_v23 = vld [vmem:[#allocation10 + $0x4] sm:$0xf] }
  0xbb   :  { %v261_v59 = vrot.slane %v260_v47, 2  ;;  %v276_v60 = vadd.f32 %v275_v48, %v268_v38  ;;  %555 = vmatpush.bf16.msra.mxu2 %v1299_v40  ;;  %v1601_v55 = vld [vmem:[#allocation10 + $0x24] sm:$0xf0] }
  0xbc   :  { %v256_v0 = vadd.f32 %v255_v53, %v254_v42  ;;  %v271_v1 = vrot.slane %v270_v54, 2  ;;  %v1619_v42 = vld [vmem:[#allocation10 + $0xb4] sm:$0xf0]  ;;  %580 = vmatpush.bf16.msrb.mxu0 %v1311_v33  ;;  %v1367_v53 = vor.u32 %v1618_v51, %v1364_v52  ;;  %v289_v51 = vld [vmem:[#allocation8] sm:$0x3] }
  0xbd   :  { %v262_v5 = vadd.f32 %v261_v59, %v260_v47  ;;  %v277_v6 = vrot.slane %v276_v60, 2  ;;  %v1363_v43 = vor.u32 %v1619_v42, %v1362_v41 }
  0xbe   :  { %v257_v10 = vrot.slane %v256_v0, 1  ;;  %v272_v11 = vadd.f32 %v271_v1, %v270_v54  ;;  %v1290_v54 = vld [vmem:[#allocation10 + $0x20] sm:$0xf]  ;;  %v1616_v1 = vld [vmem:[#allocation10 + $0xa4] sm:$0xf]  ;;  %594 = vmatpush.bf16.msrb.mxu1 %v1367_v53 }
  0xbf   :  { %v263_v15 = vrot.slane %v262_v5, 1  ;;  %v278_v16 = vadd.f32 %v277_v6, %v276_v60  ;;  %568 = vmatpush.bf16.msra.mxu3 %v1363_v43  ;;  %v1291_v59 = vor.u32 %v1601_v55, %v1290_v54  ;;  %v1617_v60 = vld [vmem:[#allocation10 + $0xa4] sm:$0xf0]  ;;  %v1599_v6 = vld [vmem:[#allocation10 + $0x14] sm:$0xf0] }
  0xc0   :  { %v273_v20 = vrot.slane %v272_v11, 1  ;;  %v258_v25 = vadd.f32 %v257_v10, %v256_v0  ;;  %581 = vmatpush.bf16.msrb.mxu0 %v1303_v50  ;;  %v1355_v63 = vor.u32 %v1617_v60, %v1354_v56  ;;  %v1295_v0 = vor.u32 %v1600_v61, %v1292_v62  ;;  %v1598_v10 = vld [vmem:[#allocation10 + $0x14] sm:$0xf] }
  0xc1   :  { %v264_v26 = vadd.f32 %v263_v15, %v262_v5  ;;  %v279_v27 = vrot.slane %v278_v16, 1  ;;  %v1359_v5 = vor.u32 %v1616_v1, %v1356_v2  ;;  %556 = vmatpush.bf16.msra.mxu2 %v1291_v59  ;;  %v1283_v8 = vor.u32 %v1599_v6, %v1282_v3  ;;  %v1614_v15 = vld [vmem:[#allocation10 + $0x94] sm:$0xf]  ;;  %v319_v59 = vld [vmem:[%s2204_s5] sm:$0x3] }
  0xc2   :  { %v274_v32 = vadd.f32 %v273_v20, %v272_v11  ;;  %v2108_v46 = vmul.f32 0.125, %v258_v25  ;;  %v1284_v11 = vld [vmem:[#allocation10 + $0x18] sm:$0xf0]  ;;  %v1338_v20 = vld [vmem:[#allocation10 + $0x80] sm:$0xf] }
  0xc3   :  { %v2106_v37 = vmul.f32 0.125, %v264_v26  ;;  %v280_v38 = vadd.f32 %v279_v27, %v278_v16  ;;  %569 = vmatpush.bf16.msra.mxu3 %v1355_v63  ;;  %v1348_v16 = vld [vmem:[#allocation10 + $0x98] sm:$0xf0]  ;;  %v1287_v17 = vor.u32 %v1598_v10, %v1284_v11  ;;  %595 = vmatpush.bf16.msrb.mxu1 %v1359_v5  ;;  %v1276_v25 = vld [vmem:[#allocation10 + $0x8] sm:$0xf0]  ;;  %v1275_v26 = vor.u32 %v1597_v19, %v1274_v18 }
  0xc4   :  { %v281_v47 = vmul.f32 0.125, %v274_v32  ;;  %v283_v57 = vmul.f32 %v2108_v46, %v2108_v46  ;;  %582 = vmatpush.bf16.msrb.mxu0 %v1295_v0  ;;  %v1351_v21 = vor.u32 %v1614_v15, %v1348_v16  ;;  %v1612_v27 = vld [vmem:[#allocation10 + $0x84] sm:$0xf]  ;;  %v1339_v31 = vor.u32 %v1613_v22, %v1338_v20  ;;  %v189_v62 = vld [vmem:[#allocation5 + $0x8] sm:$0xff] }
  0xc5   :  { %v282_v48 = vmul.f32 0.125, %v280_v38  ;;  %v284_v49 = vmul.f32 %v2106_v37, %v2106_v37  ;;  %557 = vmatpush.bf16.msra.mxu2 %v1283_v8  ;;  %v1279_v32 = vor.u32 %v1596_v23, %v1276_v25  ;;  %v1343_v34 = vor.u32 %v1612_v27, %v1340_v29  ;;  %v1458_v27 = vld [vmem:[#allocation13 + $0x70] sm:$0xf]  ;;  %v1643_v29 = vld [vmem:[#allocation13 + $0x74] sm:$0xf0] }
  0xc6   :  { %v285_v12 = vsub.f32 %v281_v47, %v283_v57  ;;  %vm343_vm9 = vcmp.lt.s32.totalorder %v189_v62, 0  ;;  %v1452_v62 = vld [vmem:[#allocation13 + $0x68] sm:$0xf0] }
  0xc7   :  { %v286_v58 = vsub.f32 %v282_v48, %v284_v49  ;;  %570 = vmatpush.bf16.msra.mxu3 %v1347_v14  ;;  %596 = vmatpush.bf16.msrb.mxu1 %v1351_v21 }
  0xc8   :  { %v287_v30 = vmax.f32 %v285_v12, 0.0  ;;  %583 = vmatpush.bf16.msrb.mxu0 %v1287_v17 }
  0xc9   :  { %v288_v4 = vmax.f32 %v286_v58, 0.0  ;;  %558 = vmatpush.bf16.msra.mxu2 %v1275_v26  ;;  %v188_v58 = vld [vmem:[#allocation5] sm:$0xff] }
  0xca   :  { %v290_v33 = vadd.f32 1e-05, %v287_v30  ;;  %vm342_vm8 = vcmp.lt.s32.totalorder %v188_v58, 0  ;;  %v1522_v30 = vld [vmem:[#allocation13 + $0xf0] sm:$0xf] }
  0xcb   :  { %v291_v13 = vadd.f32 1e-05, %v288_v4  ;;  %571 = vmatpush.bf16.msra.mxu3 %v1339_v31  ;;  %597 = vmatpush.bf16.msrb.mxu1 %v1343_v34  ;;  %v1977_v4 = vmov 0.0   ;;  %v1659_v34 = vld [vmem:[#allocation13 + $0xf4] sm:$0xf0] }
  0xcc   :  { %584 = vmatpush.bf16.msrb.mxu0 %v1279_v32  ;;  %vm298_vm5 = vweird.f32 %v290_v33  ;;  %v344_v5 = vsel %vm342_vm8, 2.0, %v1977_v4  ;;  %v345_v6 = vsel %vm343_vm9, 2.0, %v1977_v4  ;;  %v1640_v58 = vld [vmem:[#allocation13 + $0x64] sm:$0xf] }
  0xcd   :  { %1694 = vrsqrt.f32 %v291_v13  ;;  %vm308_vm2 = vweird.f32 %v291_v13 }
  0xce   :  { %1696 = vrsqrt.f32 %v290_v33 }
  0xd3   :  { %v1695_v35 = vpop.eup %1694 }
  0xd4   :  { %v303_v36 = vmul.f32 %v1695_v35, %v291_v13  ;;  %v1697_v39 = vpop.eup %1696  ;;  %vm309_vm1 = vweird.f32 %v1695_v35 }
  0xd5   :  { %v293_v41 = vmul.f32 %v1697_v39, %v290_v33  ;;  %vm310_vm3 = vmor %vm308_vm2, %vm309_vm1  ;;  %vm299_vm4 = vweird.f32 %v1697_v39  ;;  %v1459_v33 = vor.u32 %v1643_v29, %v1458_v27  ;;  %v1637_v27 = vld [vmem:[#allocation13 + $0x44] sm:$0xf0]  ;;  %v1498_v29 = vld [vmem:[#allocation13 + $0xc0] sm:$0xf] }
  0xd6   :  { %v304_v38 = vmul.f32 %v1695_v35, %v303_v36  ;;  %vm300_vm7 = vmor %vm298_vm5, %vm299_vm4 }
  0xd7   :  { %v294_v43 = vmul.f32 %v1697_v39, %v293_v41  ;;  %902 = vmatpush.bf16.msrb.mxu2 %v1459_v33  ;;  %v1653_v33 = vld [vmem:[#allocation13 + $0xc4] sm:$0xf0] }
  0xd8   :  { %v305_v40 = vmul.f32 0.5, %v304_v38  ;;  %v1523_v38 = vor.u32 %v1659_v34, %v1522_v30  ;;  %v1636_v34 = vld [vmem:[#allocation13 + $0x44] sm:$0xf] }
  0xd9   :  { %v295_v45 = vmul.f32 0.5, %v294_v43 }
  0xda   :  { %v306_v42 = vsub.f32 1.5, %v305_v40  ;;  %v1658_v40 = vld [vmem:[#allocation13 + $0xf4] sm:$0xf]  ;;  %915 = vmatpush.bf16.msrb.mxu3 %v1523_v38 }
  0xdb   :  { %v296_v48 = vsub.f32 1.5, %v295_v45  ;;  %v1450_v45 = vld [vmem:[#allocation13 + $0x60] sm:$0xf] }
  0xdc   :  { %v307_v44 = vmul.f32 %v1695_v35, %v306_v42 }
  0xdd   :  { %v297_v50 = vmul.f32 %v1697_v39, %v296_v48 }
  0xde   :  { %v311_v47 = vsel %vm310_vm3, %v1695_v35, %v307_v44  ;;  %v1642_v35 = vld [vmem:[#allocation13 + $0x74] sm:$0xf]  ;;  %v1524_v44 = vld [vmem:[#allocation13 + $0xf8] sm:$0xf0] }
  0xdf   :  { %v314_v49 = vrot.slane %v311_v47, 7  ;;  %v301_v52 = vsel %vm300_vm7, %v1697_v39, %v297_v50  ;;  %v1460_v39 = vld [vmem:[#allocation13 + $0x78] sm:$0xf0]  ;;  %v1641_v50 = vld [vmem:[#allocation13 + $0x64] sm:$0xf0] }
  0xe0   :  { %v1463_v43 = vor.u32 %v1642_v35, %v1460_v39  ;;  %v1499_v39 = vor.u32 %v1653_v33, %v1498_v29  ;;  %v1629_v29 = vld [vmem:[#allocation13 + $0x4] sm:$0xf0]  ;;  %v1628_v33 = vld [vmem:[#allocation13 + $0x4] sm:$0xf] }
  0xe1   :  { %v316_v53 = vsel %vm315_vm6, %v301_v52, %v314_v49  ;;  %v1527_v49 = vor.u32 %v1658_v40, %v1524_v44  ;;  %v1436_v40 = vld [vmem:[#allocation13 + $0x48] sm:$0xf0] }
  0xe2   :  { %v318_v54 = vmul.f32 %v316_v53, %v289_v51  ;;  %v1514_v51 = vld [vmem:[#allocation13 + $0xe0] sm:$0xf]  ;;  %928 = vmatpush.bf16.msra.mxu0 %v1463_v43  ;;  %v1439_v43 = vor.u32 %v1636_v34, %v1436_v40  ;;  %v1500_v44 = vld [vmem:[#allocation13 + $0xc8] sm:$0xf0] }
  0xe3   :  { %941 = vmatpush.bf16.msra.mxu1 %v1527_v49  ;;  %v1468_v40 = vld [vmem:[#allocation13 + $0x88] sm:$0xf0] }
  0xe4   :  { %v321_v55 = vperm.slane %v318_v54, 0  ;;  %v322_v56 = vperm.slane %v318_v54, 1 }
  0xe6   :  { %v326_v57 = vmul.f32 %v322_v56, %v2106_v37  ;;  %v325_v60 = vmul.f32 %v321_v55, %v2108_v46  ;;  %v333_v1 = vmul.f32 %v321_v55, %v2094_v24  ;;  %v334_v3 = vmul.f32 %v322_v56, %v2096_v28  ;;  %v385_v24 = vld [vmem:[%s2206_s7] sm:$0x3] }
  0xe7   :  { %v388_v28 = vperm.slane %v385_v24, 1  ;;  %v387_v15 = vperm.slane %v385_v24, 0  ;;  %v1451_v56 = vor.u32 %v1641_v50, %v1450_v45  ;;  %v1655_v24 = vld [vmem:[#allocation13 + $0xd4] sm:$0xf0]  ;;  %v1426_v45 = vld [vmem:[#allocation13 + $0x30] sm:$0xf] }
  0xe8   :  { %v329_v61 = vrot.slane %v326_v57, 7  ;;  %v1657_v57 = vld [vmem:[#allocation13 + $0xe4] sm:$0xf0] }
  0xe9   :  { %903 = vmatpush.bf16.msrb.mxu2 %v1451_v56  ;;  %v1634_v56 = vld [vmem:[#allocation13 + $0x34] sm:$0xf] }
  0xea   :  { %v330_v63 = vsel %vm315_vm6, %v325_v60, %v329_v61  ;;  %v1515_v61 = vor.u32 %v1657_v57, %v1514_v51  ;;  %v1428_v57 = vld [vmem:[#allocation13 + $0x38] sm:$0xf0] }
  0xeb   :  { %v332_v0 = vsub.f32 %v319_v59, %v330_v63  ;;  %v1656_v63 = vld [vmem:[#allocation13 + $0xe4] sm:$0xf] }
  0xec   :  { %916 = vmatpush.bf16.msrb.mxu3 %v1515_v61  ;;  %v1650_v61 = vld [vmem:[#allocation13 + $0xb4] sm:$0xf] }
  0xed   :  { %v336_v2 = vperm.slane %v332_v0, 0  ;;  %v337_v37 = vperm.slane %v332_v0, 1 }
  0xef   :  { %v340_v7 = vadd.f32 %v336_v2, %v333_v1  ;;  %v341_v46 = vadd.f32 %v337_v37, %v334_v3  ;;  %v1455_v2 = vor.u32 %v1640_v58, %v1452_v62  ;;  %v1516_v3 = vld [vmem:[#allocation13 + $0xe8] sm:$0xf0]  ;;  %v1442_v37 = vld [vmem:[#allocation13 + $0x50] sm:$0xf]  ;;  %v1492_v62 = vld [vmem:[#allocation13 + $0xb8] sm:$0xf0] }
  0xf1   :  { %v346_v8 = vmul.f32 %v344_v5, %v340_v7  ;;  %v347_v9 = vmul.f32 %v345_v6, %v341_v46  ;;  %v1519_v7 = vor.u32 %v1656_v63, %v1516_v3  ;;  %v1639_v46 = vld [vmem:[#allocation13 + $0x54] sm:$0xf0]  ;;  %929 = vmatpush.bf16.msra.mxu0 %v1455_v2  ;;  %v1633_v2 = vld [vmem:[#allocation13 + $0x24] sm:$0xf0] }
  0xf3   :  { %v351_v10 = vpack.c.bf16 %v346_v8, %v346_v8  ;;  %v352_v11 = vpack.c.bf16 %v347_v9, %v347_v9  ;;  %v1506_v8 = vld [vmem:[#allocation13 + $0xd0] sm:$0xf]  ;;  %942 = vmatpush.bf16.msra.mxu1 %v1519_v7  ;;  %v1632_v7 = vld [vmem:[#allocation13 + $0x24] sm:$0xf] }
  0xf5   :  { %559 = vmatmul.bf16.vlgmr.msra.gmra.mxu2 %v351_v10  ;;  %572 = vmatmul.bf16.vlgmr.msra.gmra.mxu3 %v352_v11 }
  0xf6   :  { %585 = vmatmul.bf16.vlgmr.msrb.gmra.mxu0 %v351_v10  ;;  %598 = vmatmul.bf16.vlgmr.msrb.gmra.mxu1 %v352_v11  ;;  %v1443_v11 = vor.u32 %v1639_v46, %v1442_v37 }
  0xf8   :  { %904 = vmatpush.bf16.msrb.mxu2 %v1443_v11 }
 0x173   :  { %v586_v12 = vpop.f32.mrf.mxu0  ;;  %v599_v13 = vpop.f32.mrf.mxu1 }
 0x174   :  { %v587_v14 = vadd.f32 %v586_v12, %v388_v28  ;;  %v1638_v28 = vld [vmem:[#allocation13 + $0x54] sm:$0xf] }
 0x176   :  { %v600_v16 = vadd.f32 %v599_v13, %v587_v14  ;;  %v1507_v14 = vor.u32 %v1655_v24, %v1506_v8  ;;  %v1420_v8 = vld [vmem:[#allocation13 + $0x28] sm:$0xf0] }
 0x177   :  { %v1423_v24 = vor.u32 %v1632_v7, %v1420_v8 }
 0x178   :  { %v2128_v17 = vmax.f32 %v600_v16, 0.0  ;;  %v560_v18 = vpop.f32.mrf.mxu2  ;;  %v573_v19 = vpop.f32.mrf.mxu3  ;;  %v1654_v16 = vld [vmem:[#allocation13 + $0xd4] sm:$0xf]  ;;  %917 = vmatpush.bf16.msrb.mxu3 %v1507_v14 }
 0x179   :  { %v561_v20 = vadd.f32 %v560_v18, %v387_v15  ;;  %v1444_v15 = vld [vmem:[#allocation13 + $0x58] sm:$0xf0] }
 0x17a   :  { %v611_v21 = vrot.slane %v2128_v17, 4  ;;  %v620_v22 = vmul.f32 %v2128_v17, %v2128_v17 }
 0x17b   :  { %v574_v23 = vadd.f32 %v573_v19, %v561_v20  ;;  %v588_v25 = vpop.f32.mrf.mxu0  ;;  %v601_v26 = vpop.f32.mrf.mxu1  ;;  %v1447_v20 = vor.u32 %v1638_v28, %v1444_v15  ;;  %v1474_v15 = vld [vmem:[#allocation13 + $0x90] sm:$0xf] }
 0x17c   :  { %v612_v31 = vadd.f32 %v611_v21, %v2128_v17  ;;  %v627_v32 = vrot.slane %v620_v22, 4  ;;  %v1508_v21 = vld [vmem:[#allocation13 + $0xd8] sm:$0xf0]  ;;  %918 = vmatpush.bf16.msrb.mxu3 %v1499_v39  ;;  %v1644_v39 = vld [vmem:[#allocation13 + $0x84] sm:$0xf] }
 0x17d   :  { %v2134_v36 = vmax.f32 %v574_v23, 0.0  ;;  %v1511_v26 = vor.u32 %v1654_v16, %v1508_v21  ;;  %930 = vmatpush.bf16.msra.mxu0 %v1447_v20  ;;  %v1647_v16 = vld [vmem:[#allocation13 + $0x94] sm:$0xf0] }
 0x17e   :  { %v613_v41 = vrot.slane %v612_v31, 2  ;;  %v628_v42 = vadd.f32 %v627_v32, %v620_v22  ;;  %v1434_v22 = vld [vmem:[#allocation13 + $0x40] sm:$0xf]  ;;  %v1475_v21 = vor.u32 %v1647_v16, %v1474_v15 }
 0x17f   :  { %v605_v47 = vrot.slane %v2134_v36, 4  ;;  %v619_v48 = vmul.f32 %v2134_v36, %v2134_v36  ;;  %v1435_v32 = vor.u32 %v1637_v27, %v1434_v22  ;;  %943 = vmatpush.bf16.msra.mxu1 %v1511_v26  ;;  %v1412_v22 = vld [vmem:[#allocation13 + $0x18] sm:$0xf0]  ;;  %v1402_v27 = vld [vmem:[#allocation13] sm:$0xf] }
 0x180   :  { %v614_v52 = vadd.f32 %v613_v41, %v612_v31  ;;  %v629_v53 = vrot.slane %v628_v42, 2  ;;  %v562_v54 = vpop.f32.mrf.mxu2  ;;  %v575_v55 = vpop.f32.mrf.mxu3  ;;  %v1652_v41 = vld [vmem:[#allocation13 + $0xc4] sm:$0xf]  ;;  %v1476_v26 = vld [vmem:[#allocation13 + $0x98] sm:$0xf0] }
 0x181   :  { %v606_v59 = vadd.f32 %v605_v47, %v2134_v36  ;;  %v621_v60 = vrot.slane %v619_v48, 4  ;;  %905 = vmatpush.bf16.msrb.mxu2 %v1435_v32  ;;  %v1635_v47 = vld [vmem:[#allocation13 + $0x34] sm:$0xf0]  ;;  %v1503_v50 = vor.u32 %v1652_v41, %v1500_v44  ;;  %931 = vmatpush.bf16.msra.mxu0 %v1439_v43  ;;  %v1645_v32 = vld [vmem:[#allocation13 + $0x84] sm:$0xf0] }
 0x182   :  { %v615_v0 = vrot.slane %v614_v52, 1  ;;  %v630_v1 = vadd.f32 %v629_v53, %v628_v42  ;;  %v1427_v51 = vor.u32 %v1635_v47, %v1426_v45  ;;  %v1651_v53 = vld [vmem:[#allocation13 + $0xb4] sm:$0xf0]  ;;  %v1471_v45 = vor.u32 %v1644_v39, %v1468_v40 }
 0x183   :  { %v607_v5 = vrot.slane %v606_v59, 2  ;;  %v622_v6 = vadd.f32 %v621_v60, %v619_v48  ;;  %944 = vmatpush.bf16.msra.mxu1 %v1503_v50  ;;  %v1431_v60 = vor.u32 %v1634_v56, %v1428_v57  ;;  %v1675_v39 = vld [vmem:[#allocation16 + $0x78] sm:$0xff] }
 0x184   :  { %v616_v9 = vadd.f32 %v615_v0, %v614_v52  ;;  %v631_v10 = vrot.slane %v630_v1, 1  ;;  %v1490_v52 = vld [vmem:[#allocation13 + $0xb0] sm:$0xf]  ;;  %v1495_v0 = vor.u32 %v1650_v61, %v1492_v62 }
 0x185   :  { %v608_v12 = vadd.f32 %v607_v5, %v606_v59  ;;  %v623_v13 = vrot.slane %v622_v6, 2  ;;  %v1491_v55 = vor.u32 %v1651_v53, %v1490_v52  ;;  %906 = vmatpush.bf16.msrb.mxu2 %v1427_v51  ;;  %v1482_v5 = vld [vmem:[#allocation13 + $0xa0] sm:$0xf]  ;;  %932 = vmatpush.bf16.msra.mxu0 %v1431_v60 }
 0x186   :  { %v2140_v18 = vmul.f32 0.125, %v616_v9  ;;  %v632_v19 = vadd.f32 %v631_v10, %v630_v1  ;;  %v1418_v1 = vld [vmem:[#allocation13 + $0x20] sm:$0xf]  ;;  %v1648_v9 = vld [vmem:[#allocation13 + $0xa4] sm:$0xf] }
 0x187   :  { %v609_v23 = vrot.slane %v608_v12, 1  ;;  %v624_v25 = vadd.f32 %v623_v13, %v622_v6  ;;  %919 = vmatpush.bf16.msrb.mxu3 %v1491_v55  ;;  %v1419_v37 = vor.u32 %v1633_v2, %v1418_v1  ;;  %v1649_v6 = vld [vmem:[#allocation13 + $0xa4] sm:$0xf0]  ;;  %v1484_v10 = vld [vmem:[#allocation13 + $0xa8] sm:$0xf0]  ;;  %945 = vmatpush.bf16.msra.mxu1 %v1495_v0 }
 0x188   :  { %v634_v30 = vmul.f32 0.125, %v632_v19  ;;  %v636_v31 = vmul.f32 %v2140_v18, %v2140_v18  ;;  %v1483_v46 = vor.u32 %v1649_v6, %v1482_v5  ;;  %v1487_v28 = vor.u32 %v1648_v9, %v1484_v10  ;;  %v1631_v13 = vld [vmem:[#allocation13 + $0x14] sm:$0xf0]  ;;  %v1630_v19 = vld [vmem:[#allocation13 + $0x14] sm:$0xf]  ;;  %v350_v6 = vld [vmem:[#allocation5 + $0x18] sm:$0xff] }
 0x189   :  { %v610_v35 = vadd.f32 %v609_v23, %v608_v12  ;;  %v625_v38 = vrot.slane %v624_v25, 1  ;;  %v1410_v12 = vld [vmem:[#allocation13 + $0x10] sm:$0xf]  ;;  %907 = vmatpush.bf16.msrb.mxu2 %v1419_v37  ;;  %v1646_v23 = vld [vmem:[#allocation13 + $0x94] sm:$0xf]  ;;  %933 = vmatpush.bf16.msra.mxu0 %v1423_v24  ;;  %vm694_vm1 = vcmp.lt.s32.totalorder %v350_v6, 0 }
 0x18a   :  { %v638_v42 = vsub.f32 %v634_v30, %v636_v31  ;;  %v1411_v14 = vor.u32 %v1631_v13, %v1410_v12  ;;  %v1479_v30 = vor.u32 %v1646_v23, %v1476_v26  ;;  %v1466_v31 = vld [vmem:[#allocation13 + $0x80] sm:$0xf]  ;;  %v696_v24 = vsel %vm694_vm1, 2.0, %v1977_v4 }
 0x18b   :  { %v2144_v48 = vmul.f32 0.125, %v610_v35  ;;  %v626_v49 = vadd.f32 %v625_v38, %v624_v25  ;;  %920 = vmatpush.bf16.msrb.mxu3 %v1483_v46  ;;  %v1415_v25 = vor.u32 %v1630_v19, %v1412_v22  ;;  %946 = vmatpush.bf16.msra.mxu1 %v1487_v28  ;;  %v1403_v35 = vor.u32 %v1629_v29, %v1402_v27  ;;  %v1404_v38 = vld [vmem:[#allocation13 + $0x8] sm:$0xf0] }
 0x18c   :  { %v640_v54 = vmax.f32 %v638_v42, 0.0  ;;  %v1467_v42 = vor.u32 %v1645_v32, %v1466_v31  ;;  %v1407_v43 = vor.u32 %v1628_v33, %v1404_v38  ;;  %v1667_v38 = vld [vmem:[#allocation16 + $0x38] sm:$0xff] }
 0x18d   :  { %v633_v58 = vmul.f32 0.125, %v626_v49  ;;  %v635_v59 = vmul.f32 %v2144_v48, %v2144_v48  ;;  %908 = vmatpush.bf16.msrb.mxu2 %v1411_v14  ;;  %934 = vmatpush.bf16.msra.mxu0 %v1415_v25 }
 0x18e   :  { %v2148_v63 = vadd.f32 1e-05, %v640_v54 }
 0x18f   :  { %v637_v3 = vsub.f32 %v633_v58, %v635_v59  ;;  %921 = vmatpush.bf16.msrb.mxu3 %v1475_v21  ;;  %947 = vmatpush.bf16.msra.mxu1 %v1479_v30  ;;  %v641_v58 = vld [vmem:[#allocation11] sm:$0x3] }
 0x190   :  { %1698 = vrsqrt.f32 %v2148_v63  ;;  %vm660_vm11 = vweird.f32 %v2148_v63 }
 0x191   :  { %v639_v11 = vmax.f32 %v637_v3, 0.0  ;;  %909 = vmatpush.bf16.msrb.mxu2 %v1403_v35  ;;  %935 = vmatpush.bf16.msra.mxu0 %v1407_v43  ;;  %v349_v3 = vld [vmem:[#allocation5 + $0x10] sm:$0xff] }
 0x192   :  { %vm693_vm0 = vcmp.lt.s32.totalorder %v349_v3, 0 }
 0x193   :  { %v642_v20 = vadd.f32 1e-05, %v639_v11  ;;  %922 = vmatpush.bf16.msrb.mxu3 %v1467_v42  ;;  %948 = vmatpush.bf16.msra.mxu1 %v1471_v45  ;;  %v695_v11 = vsel %vm693_vm0, 2.0, %v1977_v4 }
 0x195   :  { %1700 = vrsqrt.f32 %v642_v20  ;;  %vm650_vm14 = vweird.f32 %v642_v20  ;;  %1184 = vmatpush.bf16.msra.mxu2 %v1667_v38 }
 0x196   :  { %v1699_v34 = vpop.eup %1698 }
 0x197   :  { %v655_v41 = vmul.f32 %v1699_v34, %v2148_v63  ;;  %vm661_vm10 = vweird.f32 %v1699_v34  ;;  %v670_v63 = vld [vmem:[%s2208_s9] sm:$0x3]  ;;  %1197 = vmatpush.bf16.msra.mxu3 %v1675_v39 }
 0x198   :  { %vm662_vm12 = vmor %vm660_vm11, %vm661_vm10 }
 0x199   :  { %v656_v44 = vmul.f32 %v1699_v34, %v655_v41 }
 0x19b   :  { %v1701_v47 = vpop.eup %1700  ;;  %v657_v49 = vmul.f32 0.5, %v656_v44 }
 0x19c   :  { %v645_v50 = vmul.f32 %v1701_v47, %v642_v20  ;;  %vm651_vm13 = vweird.f32 %v1701_v47 }
 0x19d   :  { %v658_v51 = vsub.f32 1.5, %v657_v49  ;;  %vm652_vm15 = vmor %vm650_vm14, %vm651_vm13 }
 0x19e   :  { %v646_v52 = vmul.f32 %v1701_v47, %v645_v50 }
 0x19f   :  { %v659_v53 = vmul.f32 %v1699_v34, %v658_v51  ;;  %v1666_v51 = vld [vmem:[#allocation16 + $0x30] sm:$0xff] }
 0x1a0   :  { %v647_v54 = vmul.f32 0.5, %v646_v52  ;;  %v1674_v52 = vld [vmem:[#allocation16 + $0x70] sm:$0xff]  ;;  %1185 = vmatpush.bf16.msra.mxu2 %v1666_v51 }
 0x1a1   :  { %v663_v56 = vsel %vm662_vm12, %v1699_v34, %v659_v53  ;;  %1198 = vmatpush.bf16.msra.mxu3 %v1674_v52 }
 0x1a2   :  { %v648_v55 = vsub.f32 1.5, %v647_v54  ;;  %v666_v59 = vrot.slane %v663_v56, 7 }
 0x1a4   :  { %v649_v57 = vmul.f32 %v1701_v47, %v648_v55 }
 0x1a6   :  { %v653_v60 = vsel %vm652_vm15, %v1701_v47, %v649_v57 }
 0x1a7   :  { %v667_v61 = vsel %vm315_vm6, %v653_v60, %v666_v59 }
 0x1a8   :  { %v669_v62 = vmul.f32 %v667_v61, %v641_v58  ;;  %v1665_v61 = vld [vmem:[#allocation16 + $0x28] sm:$0xff] }
 0x1a9   :  { %1186 = vmatpush.bf16.msra.mxu2 %v1665_v61 }
 0x1aa   :  { %v672_v0 = vperm.slane %v669_v62, 0  ;;  %v673_v1 = vperm.slane %v669_v62, 1  ;;  %v1673_v62 = vld [vmem:[#allocation16 + $0x68] sm:$0xff] }
 0x1ab   :  { %1199 = vmatpush.bf16.msra.mxu3 %v1673_v62 }
 0x1ac   :  { %v677_v2 = vmul.f32 %v673_v1, %v2140_v18  ;;  %v676_v37 = vmul.f32 %v672_v0, %v2144_v48  ;;  %v684_v8 = vmul.f32 %v672_v0, %v2134_v36  ;;  %v685_v10 = vmul.f32 %v673_v1, %v2128_v17  ;;  %v736_v36 = vld [vmem:[%s2210_s11] sm:$0x3] }
 0x1ad   :  { %v739_v17 = vperm.slane %v736_v36, 1  ;;  %v738_v21 = vperm.slane %v736_v36, 0  ;;  %v1670_v36 = vld [vmem:[#allocation16 + $0x50] sm:$0xff] }
 0x1ae   :  { %v680_v5 = vrot.slane %v677_v2, 7 }
 0x1b0   :  { %v681_v7 = vsel %vm315_vm6, %v676_v37, %v680_v5 }
 0x1b1   :  { %v683_v46 = vsub.f32 %v670_v63, %v681_v7  ;;  %v1664_v7 = vld [vmem:[#allocation16 + $0x20] sm:$0xff] }
 0x1b2   :  { %1187 = vmatpush.bf16.msra.mxu2 %v1664_v7 }
 0x1b3   :  { %v687_v9 = vperm.slane %v683_v46, 0  ;;  %v688_v18 = vperm.slane %v683_v46, 1  ;;  %v1672_v46 = vld [vmem:[#allocation16 + $0x60] sm:$0xff] }
 0x1b4   :  { %1200 = vmatpush.bf16.msra.mxu3 %v1672_v46 }
 0x1b5   :  { %v691_v28 = vadd.f32 %v687_v9, %v684_v8  ;;  %v692_v12 = vadd.f32 %v688_v18, %v685_v10 }
 0x1b7   :  { %v697_v48 = vmul.f32 %v695_v11, %v691_v28  ;;  %v698_v13 = vmul.f32 %v696_v24, %v692_v12  ;;  %v1663_v28 = vld [vmem:[#allocation16 + $0x18] sm:$0xff] }
 0x1b8   :  { %v1671_v12 = vld [vmem:[#allocation16 + $0x58] sm:$0xff]  ;;  %1188 = vmatpush.bf16.msra.mxu2 %v1663_v28 }
 0x1b9   :  { %v702_v14 = vpack.c.bf16 %v697_v48, %v697_v48  ;;  %v703_v15 = vpack.c.bf16 %v698_v13, %v698_v13  ;;  %1201 = vmatpush.bf16.msra.mxu3 %v1671_v12 }
 0x1bb   :  { %910 = vmatmul.bf16.vlgmr.msrb.gmra.mxu2 %v702_v14  ;;  %923 = vmatmul.bf16.vlgmr.msrb.gmra.mxu3 %v703_v15 }
 0x1bc   :  { %936 = vmatmul.bf16.vlgmr.msra.gmra.mxu0 %v702_v14  ;;  %949 = vmatmul.bf16.vlgmr.msra.gmra.mxu1 %v703_v15  ;;  %v1662_v15 = vld [vmem:[#allocation16 + $0x10] sm:$0xff] }
 0x1bd   :  { %1189 = vmatpush.bf16.msra.mxu2 %v1662_v15  ;;  %1202 = vmatpush.bf16.msra.mxu3 %v1670_v36 }
 0x239   :  { %v937_v16 = vpop.f32.mrf.mxu0  ;;  %v950_v19 = vpop.f32.mrf.mxu1 }
 0x23a   :  { %v938_v20 = vadd.f32 %v937_v16, %v739_v17 }
 0x23c   :  { %v951_v22 = vadd.f32 %v950_v19, %v938_v20  ;;  %v1661_v19 = vld [vmem:[#allocation16 + $0x8] sm:$0xff] }
 0x23d   :  { %v1669_v20 = vld [vmem:[#allocation16 + $0x48] sm:$0xff]  ;;  %1190 = vmatpush.bf16.msra.mxu2 %v1661_v19 }
 0x23e   :  { %v2167_v23 = vmax.f32 %v951_v22, 0.0  ;;  %v911_v25 = vpop.f32.mrf.mxu2  ;;  %v924_v26 = vpop.f32.mrf.mxu3  ;;  %1203 = vmatpush.bf16.msra.mxu3 %v1669_v20 }
 0x23f   :  { %v912_v27 = vadd.f32 %v911_v25, %v738_v21  ;;  %v1660_v25 = vld [vmem:[#allocation16] sm:$0xff] }
 0x240   :  { %v962_v29 = vrot.slane %v2167_v23, 4  ;;  %v971_v30 = vmul.f32 %v2167_v23, %v2167_v23 }
 0x241   :  { %v925_v31 = vadd.f32 %v924_v26, %v912_v27  ;;  %v939_v32 = vpop.f32.mrf.mxu0  ;;  %v952_v33 = vpop.f32.mrf.mxu1  ;;  %v1668_v26 = vld [vmem:[#allocation16 + $0x40] sm:$0xff]  ;;  %1191 = vmatpush.bf16.msra.mxu2 %v1660_v25 }
 0x242   :  { %v963_v34 = vadd.f32 %v962_v29, %v2167_v23  ;;  %v978_v35 = vrot.slane %v971_v30, 4  ;;  %1204 = vmatpush.bf16.msra.mxu3 %v1668_v26 }
 0x243   :  { %v2173_v40 = vmax.f32 %v925_v31, 0.0 }
 0x244   :  { %v964_v41 = vrot.slane %v963_v34, 2  ;;  %v979_v42 = vadd.f32 %v978_v35, %v971_v30 }
 0x245   :  { %v956_v43 = vrot.slane %v2173_v40, 4  ;;  %v970_v44 = vmul.f32 %v2173_v40, %v2173_v40 }
 0x246   :  { %v965_v45 = vadd.f32 %v964_v41, %v963_v34  ;;  %v980_v47 = vrot.slane %v979_v42, 2  ;;  %v913_v49 = vpop.f32.mrf.mxu2  ;;  %v926_v50 = vpop.f32.mrf.mxu3 }
 0x247   :  { %v957_v53 = vadd.f32 %v956_v43, %v2173_v40  ;;  %v972_v54 = vrot.slane %v970_v44, 4  ;;  %v992_v43 = vld [vmem:[#allocation14] sm:$0x3] }
 0x248   :  { %v966_v55 = vrot.slane %v965_v45, 1  ;;  %v981_v56 = vadd.f32 %v980_v47, %v979_v42 }
 0x249   :  { %v958_v57 = vrot.slane %v957_v53, 2  ;;  %v973_v58 = vadd.f32 %v972_v54, %v970_v44 }
 0x24a   :  { %v967_v59 = vadd.f32 %v966_v55, %v965_v45  ;;  %v982_v60 = vrot.slane %v981_v56, 1  ;;  %v700_v55 = vld [vmem:[#allocation5 + $0x20] sm:$0xff] }
 0x24b   :  { %v959_v0 = vadd.f32 %v958_v57, %v957_v53  ;;  %v974_v1 = vrot.slane %v973_v58, 2  ;;  %v701_v57 = vld [vmem:[#allocation5 + $0x28] sm:$0xff]  ;;  %vm1044_vm9 = vcmp.lt.s32.totalorder %v700_v55, 0 }
 0x24c   :  { %v2179_v2 = vmul.f32 0.125, %v967_v59  ;;  %v983_v3 = vadd.f32 %v982_v60, %v981_v56  ;;  %v1021_v56 = vld [vmem:[%s2212_s13] sm:$0x3]  ;;  %vm1045_vm10 = vcmp.lt.s32.totalorder %v701_v57, 0 }
 0x24d   :  { %v960_v63 = vrot.slane %v959_v0, 1  ;;  %v975_v37 = vadd.f32 %v974_v1, %v973_v58  ;;  %v1046_v1 = vsel %vm1044_vm9, 2.0, %v1977_v4 }
 0x24e   :  { %v985_v5 = vmul.f32 0.125, %v983_v3  ;;  %v987_v6 = vmul.f32 %v2179_v2, %v2179_v2 }
 0x24f   :  { %v961_v8 = vadd.f32 %v960_v63, %v959_v0  ;;  %v976_v9 = vrot.slane %v975_v37, 1 }
 0x250   :  { %v989_v10 = vsub.f32 %v985_v5, %v987_v6 }
 0x251   :  { %v968_v18 = vmul.f32 0.125, %v961_v8  ;;  %v977_v11 = vadd.f32 %v976_v9, %v975_v37 }
 0x252   :  { %v991_v24 = vmax.f32 %v989_v10, 0.0 }
 0x253   :  { %v984_v48 = vmul.f32 0.125, %v977_v11  ;;  %v986_v13 = vmul.f32 %v968_v18, %v968_v18 }
 0x254   :  { %v994_v14 = vadd.f32 1e-05, %v991_v24 }
 0x255   :  { %v988_v17 = vsub.f32 %v984_v48, %v986_v13 }
 0x256   :  { %1702 = vrsqrt.f32 %v994_v14  ;;  %vm1011_vm3 = vweird.f32 %v994_v14 }
 0x257   :  { %v990_v16 = vmax.f32 %v988_v17, 0.0 }
 0x259   :  { %v993_v21 = vadd.f32 1e-05, %v990_v16 }
 0x25b   :  { %1704 = vrsqrt.f32 %v993_v21  ;;  %vm1001_vm7 = vweird.f32 %v993_v21 }
 0x25c   :  { %v1703_v22 = vpop.eup %1702 }
 0x25d   :  { %v1006_v27 = vmul.f32 %v1703_v22, %v994_v14  ;;  %vm1012_vm2 = vweird.f32 %v1703_v22 }
 0x25e   :  { %vm1013_vm4 = vmor %vm1011_vm3, %vm1012_vm2 }
 0x25f   :  { %v1007_v29 = vmul.f32 %v1703_v22, %v1006_v27 }
 0x261   :  { %v1705_v30 = vpop.eup %1704  ;;  %v1008_v31 = vmul.f32 0.5, %v1007_v29 }
 0x262   :  { %v996_v32 = vmul.f32 %v1705_v30, %v993_v21  ;;  %vm1002_vm5 = vweird.f32 %v1705_v30 }
 0x263   :  { %v1009_v33 = vsub.f32 1.5, %v1008_v31  ;;  %vm1003_vm8 = vmor %vm1001_vm7, %vm1002_vm5 }
 0x264   :  { %v997_v34 = vmul.f32 %v1705_v30, %v996_v32 }
 0x265   :  { %v1010_v35 = vmul.f32 %v1703_v22, %v1009_v33 }
 0x266   :  { %v998_v38 = vmul.f32 0.5, %v997_v34 }
 0x267   :  { %v1014_v41 = vsel %vm1013_vm4, %v1703_v22, %v1010_v35 }
 0x268   :  { %v999_v39 = vsub.f32 1.5, %v998_v38  ;;  %v1017_v44 = vrot.slane %v1014_v41, 7 }
 0x26a   :  { %v1000_v42 = vmul.f32 %v1705_v30, %v999_v39 }
 0x26c   :  { %v1004_v45 = vsel %vm1003_vm8, %v1705_v30, %v1000_v42 }
 0x26d   :  { %v1018_v47 = vsel %vm315_vm6, %v1004_v45, %v1017_v44 }
 0x26e   :  { %v1020_v49 = vmul.f32 %v1018_v47, %v992_v43 }
 0x270   :  { %v1023_v50 = vperm.slane %v1020_v49, 0  ;;  %v1024_v51 = vperm.slane %v1020_v49, 1 }
 0x272   :  { %v1028_v52 = vmul.f32 %v1024_v51, %v2179_v2  ;;  %v1027_v53 = vmul.f32 %v1023_v50, %v968_v18  ;;  %v1035_v60 = vmul.f32 %v1023_v50, %v2173_v40  ;;  %v1036_v62 = vmul.f32 %v1024_v51, %v2167_v23  ;;  %v1693_v40 = vld [vmem:[%s2214_s15] ss:$0 sm:$0xff]  ;;  %s1978_s15 = smov [#allocation17]  }
 0x273   :  { %v1047_v2 = vsel %vm1045_vm10, 2.0, %v1977_v4  ;;  %s1238_s26 = sshll.u32 %s1978_s15, 4  ;;  %s1239_s26 = int_to_ptr.vmem [resolvable:$true] %s1238_s26 }
 0x274   :  { %v1031_v54 = vrot.slane %v1028_v52, 7 }
 0x276   :  { %v1032_v58 = vsel %vm315_vm6, %v1027_v53, %v1031_v54 }
 0x277   :  { %v1034_v59 = vsub.f32 %v1021_v56, %v1032_v58 }
 0x279   :  { %v1038_v61 = vperm.slane %v1034_v59, 0  ;;  %v1039_v0 = vperm.slane %v1034_v59, 1 }
 0x27b   :  { %v1042_v3 = vadd.f32 %v1038_v61, %v1035_v60  ;;  %v1043_v63 = vadd.f32 %v1039_v0, %v1036_v62 }
 0x27d   :  { %v1048_v37 = vmul.f32 %v1046_v1, %v1042_v3  ;;  %v1049_v5 = vmul.f32 %v1047_v2, %v1043_v63 }
 0x27f   :  { %v1050_v6 = vpack.c.bf16 %v1048_v37, %v1048_v37  ;;  %v1051_v7 = vpack.c.bf16 %v1049_v5, %v1049_v5 }
 0x281   :  { %1192 = vmatmul.bf16.vlgmr.msra.gmra.mxu2 %v1050_v6  ;;  %1205 = vmatmul.bf16.vlgmr.msra.gmra.mxu3 %v1051_v7 }
 0x304   :  { %v1193_v46 = vpop.f32.mrf.mxu2  ;;  %v1206_v8 = vpop.f32.mrf.mxu3 }
 0x305   :  { %v1194_v23 = vadd.f32 %v1693_v40, %v1193_v46 }
 0x307   :  { %v1207_v9 = vadd.f32 %v1206_v8, %v1194_v23 }
 0x309   :  { %1210 = vmax.xlane.f32.xlu0 %v1207_v9 }
 0x30c   :  { %v1195_v10 = vpop.f32.mrf.mxu2  ;;  %v1208_v18 = vpop.f32.mrf.mxu3 }
 0x37c   :  { %v1211_v4 = vpop.xlane.xlu0 %1210 }
 0x37d   :  { %v1212_v11 = vsub.f32 %v1207_v9, %v1211_v4 }
 0x37f   :  { %v1213_v24 = vmul.f32 1.442695, %v1212_v11 }
 0x381   :  { %1706 = vpow2.f32 %v1213_v24 }
 0x387   :  { %v1707_v28 = vpop.eup %1706 }
 0x388   :  { %1215 = vadd.xlane.f32.xlu0 %v1707_v28 }
 0x3fb   :  { %v1216_v12 = vpop.xlane.xlu0 %1215 }
 0x3fc   :  { %1708 = vrcp.f32 %v1216_v12  ;;  %v1228_v15 = vand.u32 2147483648, %v1216_v12  ;;  %v1226_v17 = vand.u32 2147483647, %v1216_v12  ;;  %vm1222_vm11 = vweird.f32 %v1216_v12 }
 0x3fe   :  { %v1229_v19 = vor.u32 1.1754944e-38, %v1228_v15  ;;  %vm1227_vm13 = vcmp.eq.f32.partialorder %v1226_v17, 8.507059e+37 }
 0x402   :  { %v1709_v48 = vpop.eup %1708 }
 0x403   :  { %v1218_v13 = vmul.f32 %v1709_v48, %v1216_v12  ;;  %vm1223_vm6 = vweird.f32 %v1709_v48 }
 0x404   :  { %vm1224_vm12 = vmor %vm1222_vm11, %vm1223_vm6 }
 0x405   :  { %v1219_v14 = vsub.f32 1.0, %v1218_v13 }
 0x407   :  { %v1220_v36 = vmul.f32 %v1709_v48, %v1219_v14 }
 0x409   :  { %v1221_v16 = vadd.f32 %v1709_v48, %v1220_v36 }
 0x40b   :  { %v1225_v20 = vsel %vm1224_vm12, %v1709_v48, %v1221_v16 }
 0x40c   :  { %v1230_v21 = vsel %vm1227_vm13, %v1229_v19, %v1225_v20 }
 0x40d   :  { %v1231_v22 = vmul.f32 %v1707_v28, %v1230_v21 }
 0x40f   :  { %1232 = vst [vmem:[#allocation17] sm:$0xff] %v1231_v22 }
 0x410   :  { %1243 = dma.vmem_to_hbm [thread:$0]  %s1239_s26, 128, %s1241_s2, [#allocation4]  }
 0x411   :  { %1960 = dma.done.wait [#allocation4], 128  }
 0x412   :  { %1961 = vsyncadd [#allocation4], 4294967168 }
 0x413   :  { %1248 = vsyncpa [#allocation3], 1 }
 0x414   :  { %1249 = vsyncpa [#allocation6], 1 }
 0x415   :  { %1250 = vsyncpa [#allocation9], 1 }
 0x416   :  { %1251 = vsyncpa [#allocation12], 1 }
 0x417   :  { %1252 = vsyncpa [#allocation15], 1 }
 0x418   :  { %1253 = vsyncpa [#allocation4], 1 }

</bundles_post_ra>
